<compile_context>
chip_gen: v7x
topology: tpu7x:2x2x1
jax: 0.10.0
libtpu: 0.0.40
codegen_flags: <defaults>
</compile_context>

<pallas_src>
import functools

import jax
import jax.numpy as jnp
from jax import lax
from jax.experimental import pallas as pl
from jax.experimental.pallas import tpu as pltpu


_ONEHOT_MAX_VOCAB = 2048   # above this the (T, V) one-hot tile gets too fat
_DMA_DEPTH = 8             # outstanding HBM row DMAs in the gather path


def _round_up(x: int, m: int) -> int:
    return ((x + m - 1) // m) * m


def _vmem_budget_bytes() -> int:
    """Per-chip VMEM limit with ~8 MiB headroom (~56 MiB v7x, ~120 MiB v5e/v6e)."""
    try:
        cap = int(pltpu.get_tpu_info().vmem_capacity_bytes)
    except Exception:
        cap = 64 << 20                     # conservative: v7x per-TensorCore VMEM
    return cap - (8 << 20)


def _pick_tokens_per_step(n_tokens, d_pad, vocab, itemsize, onehot):
    """Tokens per grid step: ~1 MiB output tiles (per-step overhead ~0.35us)."""
    t = (1 << 20) // max(d_pad * itemsize, 1)
    if onehot:
        # keep the (T, V) f32 one-hot intermediate around <= 4 MiB
        t = min(t, (4 << 20) // max(4 * vocab, 1))
    t = max(256, min(2048, t))
    t = (t // 256) * 256
    # don't pad tiny workloads (e.g. the demo's 16 tokens) up to huge tiles
    t = min(t, _round_up(max(n_tokens, 1), 256))
    return t


# -----------------------------------------------------------------------------
# Path 1: small/moderate vocab -> VMEM-resident table, one-hot MXU gather.
# -----------------------------------------------------------------------------
def _onehot_embed_kernel(ids_ref, table_ref, out_ref):
    # ids_ref   : (T, 1)    int32 -- this chunk's token ids (VMEM block)
    # table_ref : (V, D_pad)      -- whole table, VMEM-resident (constant index)
    # out_ref   : (T, D_pad)      -- lane/sublane-dense output tile
    t = out_ref.shape[0]
    v = table_ref.shape[0]
    onehot = (lax.broadcasted_iota(jnp.int32, (t, v), 1)
              == ids_ref[...]).astype(table_ref.dtype)
    out_ref[...] = jnp.dot(
        onehot, table_ref[...], preferred_element_type=jnp.float32
    ).astype(out_ref.dtype)


def _onehot_gather(ids, table, *, tokens_per_step, budget):
    n_pad = ids.shape[0]
    vocab, d_pad = table.shape
    t = tokens_per_step
    num_chunks = n_pad // t
    itemsize = jnp.dtype(table.dtype).itemsize

    ids2 = ids.reshape(n_pad, 1)

    vmem_needed = (2 * vocab * d_pad * itemsize    # table (worst case: 2 bufs)
                   + 2 * t * d_pad * itemsize      # pipelined output tiles
                   + 2 * t * 4                     # ids tiles
                   + t * vocab * 4                 # one-hot intermediate
                   + (2 << 20))
    vmem_limit = int(min(max(vmem_needed, 16 << 20), budget))

    def run(single_buffer_table):
        if single_buffer_table:
            # Constant block index: DMA'd once and kept resident; Buffered(1)
            # halves the table's VMEM footprint vs the default double buffer.
            table_spec = pl.BlockSpec((vocab, d_pad), lambda i: (0, 0),
                                      pipeline_mode=pl.Buffered(1))
        else:
            table_spec = pl.BlockSpec((vocab, d_pad), lambda i: (0, 0))
        return pl.pallas_call(
            _onehot_embed_kernel,
            out_shape=jax.ShapeDtypeStruct((n_pad, d_pad), table.dtype),
            grid=(num_chunks,),
            in_specs=[pl.BlockSpec((t, 1), lambda i: (i, 0)), table_spec],
            out_specs=pl.BlockSpec((t, d_pad), lambda i: (i, 0)),
            compiler_params=pltpu.CompilerParams(
                dimension_semantics=("parallel",),   # megacore on v7x
                vmem_limit_bytes=vmem_limit,
            ),
        )(ids2, table)

    try:
        return run(single_buffer_table=True)
    except Exception:
        # pl.Buffered(1) not honored on this jax/lowering path: fall back to
        # the default (still fetched-once) double-buffered table spec.
        return run(single_buffer_table=False)


# -----------------------------------------------------------------------------
# Path 2: large vocab -> table stays in HBM, deep-pipelined per-row DMA gather.
# -----------------------------------------------------------------------------
def _dma_gather_kernel(ids_ref, table_hbm, out_ref, copy_sems, *,
                       tokens_per_step, depth, ids_blocked):
    # ids_ref   : (1, T) int32 SMEM block (ids_blocked) or (N_pad,) prefetch
    # table_hbm : (V, D_pad) raw HBM ref (memory_space=pl.ANY)
    # out_ref   : (T, D_pad) VMEM output tile
    # copy_sems : (depth,) DMA semaphores -> `depth` outstanding row copies
    if ids_blocked:
        def token_at(j):
            return ids_ref[0, j]
    else:
        base = pl.program_id(0) * tokens_per_step

        def token_at(j):
            return ids_ref[base + j]

    def row_copy(j, slot):
        return pltpu.make_async_copy(
            table_hbm.at[pl.ds(token_at(j), 1), :],
            out_ref.at[pl.ds(j, 1), :],
            copy_sems.at[slot])

    prime = min(depth, tokens_per_step)

    @pl.loop(0, prime)
    def _(j):
        row_copy(j, j % depth).start()

    @pl.loop(0, tokens_per_step)
    def _(j):
        row_copy(j, j % depth).wait()

        @pl.when(j + depth < tokens_per_step)
        def _():
            row_copy(j + depth, j % depth).start()


def _dma_gather(ids, table, *, tokens_per_step, budget):
    n_pad = ids.shape[0]
    vocab, d_pad = table.shape
    t = tokens_per_step
    num_chunks = n_pad // t
    itemsize = jnp.dtype(table.dtype).itemsize
    depth = min(_DMA_DEPTH, t)

    vmem_needed = 2 * t * d_pad * itemsize + (2 << 20)
    vmem_limit = int(min(max(vmem_needed, 16 << 20), budget))
    cparams = pltpu.CompilerParams(
        dimension_semantics=("parallel",),
        vmem_limit_bytes=vmem_limit,
    )
    out_shape = jax.ShapeDtypeStruct((n_pad, d_pad), table.dtype)
    scratch = [pltpu.SemaphoreType.DMA((depth,))]

    def run_blocked_smem_ids():
        # ids arrive as a per-step (1, T) SMEM block: SMEM use is O(T), not O(N).
        kernel = functools.partial(_dma_gather_kernel, tokens_per_step=t,
                                   depth=depth, ids_blocked=True)
        return pl.pallas_call(
            kernel,
            out_shape=out_shape,
            grid=(num_chunks,),
            in_specs=[
                pl.BlockSpec((1, t), lambda i: (i, 0),
                             memory_space=pltpu.MemorySpace.SMEM),
                pl.BlockSpec(memory_space=pl.ANY),      # table stays in HBM
            ],
            out_specs=pl.BlockSpec((t, d_pad), lambda i: (i, 0)),
            scratch_shapes=scratch,
            compiler_params=cparams,
        )(ids.reshape(num_chunks, t), table)

    def run_prefetched_ids():
        # Fallback: scalar-prefetch all ids (pads SMEM to next_pow2(4N) bytes,
        # only used if blocked SMEM inputs are rejected on this jax version).
        kernel = functools.partial(_dma_gather_kernel, tokens_per_step=t,
                                   depth=depth, ids_blocked=False)
        return pl.pallas_call(
            kernel,
            out_shape=out_shape,
            grid_spec=pltpu.PrefetchScalarGridSpec(
                num_scalar_prefetch=1,
                grid=(num_chunks,),
                in_specs=[pl.BlockSpec(memory_space=pl.ANY)],
                out_specs=pl.BlockSpec((t, d_pad), lambda i, ids: (i, 0)),
                scratch_shapes=scratch,
            ),
            compiler_params=cparams,
        )(ids, table)

    try:
        return run_blocked_smem_ids()
    except Exception:
        return run_prefetched_ids()


# -----------------------------------------------------------------------------
# Wrapper: equivalent of TokenEmbedding.forward (frozen nn.Embedding lookup).
# -----------------------------------------------------------------------------
def token_embedding(input_ids: jax.Array, emb_table: jax.Array,
                    *, gather_impl: str = "auto") -> jax.Array:
    """(B, S) int token ids -> (B, S, D) embeddings (frozen lookup table).

    gather_impl: "auto" | "onehot" | "dma"
      onehot : table VMEM-resident, gather = one-hot @ table on the MXU
      dma    : table stays in HBM, pipelined per-token row DMAs (any vocab)
    """
    B, S = input_ids.shape
    V, D = emb_table.shape
    N = B * S
    itemsize = jnp.dtype(emb_table.dtype).itemsize

    # Lane-dense output: pad the embed dim to a multiple of 128 so output
    # stores are unmasked vst (biggest measured store-side lever).
    D_pad = _round_up(D, 128)
    table = emb_table if D_pad == D else jnp.pad(
        emb_table, ((0, 0), (0, D_pad - D)))

    # Clamp out-of-range ids: Pallas performs no runtime bounds check on the
    # gather index (PyTorch's nn.Embedding would raise).
    # TODO(synk): optionally add a pl.debug_check under enable_debug_checks()
    # instead of silently clamping bad ids.
    ids = jnp.clip(input_ids.reshape(N).astype(jnp.int32), 0, V - 1)

    budget = _vmem_budget_bytes()

    want_onehot = gather_impl in ("auto", "onehot") and V <= _ONEHOT_MAX_VOCAB
    T = _pick_tokens_per_step(N, D_pad, V, itemsize, want_onehot)
    tile_bytes = T * D_pad * itemsize
    table_bytes = V * D_pad * itemsize
    # Residency check assumes the worst case of a double-buffered table spec
    # (the pl.Buffered(1) single-buffer request may not be honored everywhere).
    fits_resident = 2 * table_bytes + 2 * tile_bytes + (4 << 20) <= budget
    use_onehot = want_onehot and fits_resident
    if gather_impl == "onehot" and not use_onehot:
        raise ValueError("embedding table too large for the VMEM-resident "
                         "one-hot path on this chip; use gather_impl='dma'")
    if gather_impl == "dma":
        use_onehot = False

    # Pad the token count to whole (T,)-chunks; padded ids hit row 0 and the
    # padded rows are sliced away below.  Note: real workloads should yield
    # num_chunks >= 2 so the "parallel" chunk axis shards across both v7x TCs.
    n_pad = _round_up(N, T)
    if n_pad != N:
        ids = jnp.pad(ids, (0, n_pad - N))

    if use_onehot:
        out = _onehot_gather(ids, table, tokens_per_step=T, budget=budget)
    else:
        out = _dma_gather(ids, table, tokens_per_step=T, budget=budget)

    return out[:N, :D].reshape(B, S, D)


if __name__ == "__main__":
    key = jax.random.PRNGKey(0)
    k_tbl, k_ids = jax.random.split(key)

    # Small synthetic "pretrained" embedding table (vocab=64, embed_dim=32).
    VOCAB, EMBED_DIM = 64, 32
    B, S = 2, 8

    emb_table = jax.random.normal(k_tbl, (VOCAB, EMBED_DIM), dtype=jnp.float32)
    input_ids = jax.random.randint(k_ids, (B, S), 0, VOCAB, dtype=jnp.int32)

    ref = jnp.take(emb_table, input_ids, axis=0)

    # Auto path selection (small vocab -> one-hot MXU gather).
    out = jax.block_until_ready(token_embedding(input_ids, emb_table))
    assert out.shape == (B, S, EMBED_DIM)
    assert out.dtype == emb_table.dtype
    assert jnp.allclose(out, ref), "one-hot gather mismatch vs reference"

    # Also exercise the large-vocab HBM row-DMA gather path on the same data.
    out_dma = jax.block_until_ready(
        token_embedding(input_ids, emb_table, gather_impl="dma"))
    assert jnp.allclose(out_dma, ref), "DMA gather mismatch vs reference"

    print("KERNEL_OK")
</pallas_src>

<mosaic_0001>
module attributes {stable_mosaic.version = 11 : i64} {
  func.func @_onehot_embed_kernel(%arg0: i32, %arg1: memref<256x1xi32, #tpu.memory_space<vmem>>, %arg2: memref<64x128xf32, #tpu.memory_space<vmem>>, %arg3: memref<256x128xf32, #tpu.memory_space<vmem>>) attributes {dimension_semantics = [#tpu.dimension_semantics<parallel>], iteration_bounds = array<i64: 1>, scalar_prefetch = 0 : i64, scratch_operands = 0 : i64, tpu.core_type = #tpu.core_type<tc>, window_params = [{transform_indices = @transform_0, window_bounds = array<i64: 256, 1>}, {pipeline_mode = #tpu.pipeline_mode<synchronous>, transform_indices = @transform_1, window_bounds = array<i64: 64, 128>}, {transform_indices = @transform_2, window_bounds = array<i64: 256, 128>}]} {
    %0 = tpu.iota {dimensions = array<i32: 1>} : vector<256x64xi32>
    %c0 = arith.constant 0 : index
    %c0_0 = arith.constant 0 : index
    %1 = vector.load %arg1[%c0, %c0_0] : memref<256x1xi32, #tpu.memory_space<vmem>>, vector<256x1xi32>
    %2 = vector.broadcast %1 : vector<256x1xi32> to vector<256x64xi32>
    %3 = arith.cmpi eq, %0, %2 : vector<256x64xi32>
    %4 = arith.extui %3 : vector<256x64xi1> to vector<256x64xi32>
    %5 = arith.sitofp %4 : vector<256x64xi32> to vector<256x64xf32>
    %c0_1 = arith.constant 0 : index
    %c0_2 = arith.constant 0 : index
    %6 = vector.load %arg2[%c0_1, %c0_2] : memref<64x128xf32, #tpu.memory_space<vmem>>, vector<64x128xf32>
    %cst = arith.constant dense<0.000000e+00> : vector<256x128xf32>
    %7 = tpu.matmul %5, %6, %cst {dimension_numbers = #tpu.dot_dimension_numbers<[1], [0], [0], [1], [0, 0, 1, 1], [], []>} : vector<256x64xf32>, vector<64x128xf32>, vector<256x128xf32> -> vector<256x128xf32>
    %c0_3 = arith.constant 0 : index
    %c0_4 = arith.constant 0 : index
    %8 = vector.load %arg3[%c0_3, %c0_4] : memref<256x128xf32, #tpu.memory_space<vmem>>, vector<256x128xf32>
    tpu.vector_store %arg3[%c0_3, %c0_4], %7 {strides = array<i32>} : memref<256x128xf32, #tpu.memory_space<vmem>>, vector<256x128xf32>,
    return
  }
  func.func @transform_0(%arg0: i32) -> (i32, i32) {
    %c0_i32 = arith.constant 0 : i32
    %c0_i32_0 = arith.constant 0 : i32
    return %arg0, %c0_i32 : i32, i32
  }
  func.func @transform_1(%arg0: i32) -> (i32, i32) {
    %c0_i32 = arith.constant 0 : i32
    %c0_i32_0 = arith.constant 0 : i32
    %c0_i32_1 = arith.constant 0 : i32
    return %c0_i32, %c0_i32_0 : i32, i32
  }
  func.func @transform_2(%arg0: i32) -> (i32, i32) {
    %c0_i32 = arith.constant 0 : i32
    %c0_i32_0 = arith.constant 0 : i32
    return %arg0, %c0_i32 : i32, i32
  }
}

module attributes {stable_mosaic.version = 11 : i64} {
  func.func @_onehot_embed_kernel(%arg0: i32, %arg1: memref<256x1xi32, #tpu.memory_space<vmem>>, %arg2: memref<64x128xf32, #tpu.memory_space<vmem>>, %arg3: memref<256x128xf32, #tpu.memory_space<vmem>>) attributes {dimension_semantics = [#tpu.dimension_semantics<parallel>], iteration_bounds = array<i64: 1>, scalar_prefetch = 0 : i64, scratch_operands = 0 : i64, tpu.core_type = #tpu.core_type<tc>, window_params = [{transform_indices = @transform_0, window_bounds = array<i64: 256, 1>}, {pipeline_mode = #tpu.pipeline_mode<synchronous>, transform_indices = @transform_1, window_bounds = array<i64: 64, 128>}, {transform_indices = @transform_2, window_bounds = array<i64: 256, 128>}]} {
    %0 = tpu.iota {dimensions = array<i32: 1>} : vector<256x64xi32>
    %c0 = arith.constant 0 : index
    %c0_0 = arith.constant 0 : index
    %1 = vector.load %arg1[%c0, %c0_0] : memref<256x1xi32, #tpu.memory_space<vmem>>, vector<256x1xi32>
    %2 = vector.broadcast %1 : vector<256x1xi32> to vector<256x64xi32>
    %3 = arith.cmpi eq, %0, %2 : vector<256x64xi32>
    %4 = arith.extui %3 : vector<256x64xi1> to vector<256x64xi32>
    %5 = arith.sitofp %4 : vector<256x64xi32> to vector<256x64xf32>
    %c0_1 = arith.constant 0 : index
    %c0_2 = arith.constant 0 : index
    %6 = vector.load %arg2[%c0_1, %c0_2] : memref<64x128xf32, #tpu.memory_space<vmem>>, vector<64x128xf32>
    %cst = arith.constant dense<0.000000e+00> : vector<256x128xf32>
    %7 = tpu.matmul %5, %6, %cst {dimension_numbers = #tpu.dot_dimension_numbers<[1], [0], [0], [1], [0, 0, 1, 1], [], []>} : vector<256x64xf32>, vector<64x128xf32>, vector<256x128xf32> -> vector<256x128xf32>
    %c0_3 = arith.constant 0 : index
    %c0_4 = arith.constant 0 : index
    %8 = vector.load %arg3[%c0_3, %c0_4] : memref<256x128xf32, #tpu.memory_space<vmem>>, vector<256x128xf32>
    tpu.vector_store %arg3[%c0_3, %c0_4], %7 {strides = array<i32>} : memref<256x128xf32, #tpu.memory_space<vmem>>, vector<256x128xf32>,
    return
  }
  func.func @transform_0(%arg0: i32) -> (i32, i32) {
    %c0_i32 = arith.constant 0 : i32
    %c0_i32_0 = arith.constant 0 : i32
    return %arg0, %c0_i32 : i32, i32
  }
  func.func @transform_1(%arg0: i32) -> (i32, i32) {
    %c0_i32 = arith.constant 0 : i32
    %c0_i32_0 = arith.constant 0 : i32
    %c0_i32_1 = arith.constant 0 : i32
    return %c0_i32, %c0_i32_0 : i32, i32
  }
  func.func @transform_2(%arg0: i32) -> (i32, i32) {
    %c0_i32 = arith.constant 0 : i32
    %c0_i32_0 = arith.constant 0 : i32
    return %arg0, %c0_i32 : i32, i32
  }
}

</mosaic_0001>

<bundles_post_ra>
// kernel: tpu_custom_call.1
= control target key start
LH: loop header
LB: loop body
LE: loop exit
PB: predicated region body
PF: predicated region fallthrough
CT: control target
= control target key end

     0   :  { %v839_v2 = vmov 0   ;;  %s1089_s0 = inlined_call_operand.vmem [shape: s32[256,1], index: 0, kind: input, shape index: {}]   ;;  %s1090_s1 = inlined_call_operand.vmem [shape: f32[64,128], index: 1, kind: input, shape index: {}]   ;;  %s1091_s2 = inlined_call_operand.hbm [shape: f32[256,128], index: 2, kind: output, shape index: {}]  }
   0x1   :  { %v15_v0 = vld [vmem:[%s1089_s0 + $0x8] sm:$0xff]  ;;  %v14_v1 = vld [vmem:[%s1089_s0] sm:$0xff]  ;;  %814 = vset.pattern.permute.xlu1 %v839_v2  ;;  %813 = vset.pattern.permute.xlu0 %v839_v2  ;;  %v32_v5 = vld [vmem:[%s1089_s0 + $0x90] sm:$0xff] }
   0x2   :  { %50 = vperm.xlu1 %814, %v15_v0   ;;  %47 = vperm.xlu0 %813, %v14_v1   ;;  %v31_v3 = vld [vmem:[%s1089_s0 + $0x88] sm:$0xff]  ;;  %v30_v4 = vld [vmem:[%s1089_s0 + $0x80] sm:$0xff]  ;;  %v16_v6 = vld [vmem:[%s1089_s0 + $0x10] sm:$0xff] }
   0x3   :  { %v33_v7 = vld [vmem:[%s1089_s0 + $0x98] sm:$0xff]  ;;  %v238_v9 = vld [vmem:[%s1090_s1] sm:$0xff]  ;;  %v239_v10 = vld [vmem:[%s1090_s1 + $0x8] sm:$0xff] }
   0x4   :  { %v17_v8 = vld [vmem:[%s1089_s0 + $0x18] sm:$0xff]  ;;  %v240_v11 = vld [vmem:[%s1090_s1 + $0x10] sm:$0xff]  ;;  %v784_v13 = vpack.c.bf16 %v239_v10, %v238_v9 }
   0x5   :  { %v241_v12 = vld [vmem:[%s1090_s1 + $0x18] sm:$0xff] }
   0x6   :  { %98 = vperm.xlu1 %814, %v31_v3   ;;  %95 = vperm.xlu0 %813, %v30_v4   ;;  %v788_v14 = vpack.c.bf16 %v241_v12, %v240_v11 }
   0xa   :  { %101 = vperm.xlu1 %814, %v32_v5   ;;  %53 = vperm.xlu0 %813, %v16_v6  }
   0xb   :  { %7 = vsyncpa [#allocation3], 0  ;;  %v242_v15 = vld [vmem:[%s1090_s1 + $0x20] sm:$0xff]  ;;  %v243_v16 = vld [vmem:[%s1090_s1 + $0x28] sm:$0xff]  ;;  %785 = vmatprep.subr.bf16.mxu0 %v784_v13  ;;  %800 = vmatprep.subr.bf16.mxu1 %v784_v13  ;;  %v12_v45 = vlaneseq  ;;  %vm246_vm0 = vcmask 523264   ;;  %v840_v49 = vmov 0.0  }
   0xc   :  { %v34_v17 = vld [vmem:[%s1089_s0 + $0xa0] sm:$0xff]  ;;  %787 = vmatpush3.bf16.msra.mxu0 %v784_v13  ;;  %804 = vmatpush3.bf16.msra.mxu1 %v784_v13  ;;  %v792_v19 = vpack.c.bf16 %v243_v16, %v242_v15  ;;  %v244_v20 = vld [vmem:[%s1090_s1 + $0x30] sm:$0xff]  ;;  %v245_v21 = vld [vmem:[%s1090_s1 + $0x38] sm:$0xff] }
   0xd   :  { %v18_v18 = vld [vmem:[%s1089_s0 + $0x20] sm:$0xff]  ;;  %789 = vmatprep.subr.bf16.mxu0 %v788_v14  ;;  %801 = vmatprep.subr.bf16.mxu1 %v788_v14  ;;  %v35_v22 = vld [vmem:[%s1089_s0 + $0xa8] sm:$0xff]  ;;  %v796_v24 = vpack.c.bf16 %v245_v21, %v244_v20  ;;  %v36_v25 = vld [vmem:[%s1089_s0 + $0xb0] sm:$0xff]  ;;  %v979_v46 = vand.u32 127, %v12_v45 }
   0xe   :  { %104 = vperm.xlu1 %814, %v33_v7   ;;  %56 = vperm.xlu0 %813, %v17_v8   ;;  %v19_v23 = vld [vmem:[%s1089_s0 + $0x28] sm:$0xff]  ;;  %v20_v26 = vld [vmem:[%s1089_s0 + $0x30] sm:$0xff]  ;;  %v37_v27 = vld [vmem:[%s1089_s0 + $0xb8] sm:$0xff] }
   0xf   :  { %v21_v28 = vld [vmem:[%s1089_s0 + $0x38] sm:$0xff]  ;;  %v38_v29 = vld [vmem:[%s1089_s0 + $0xc0] sm:$0xff]  ;;  %v39_v31 = vld [vmem:[%s1089_s0 + $0xc8] sm:$0xff] }
  0x10   :  { %791 = vmatpush3.bf16.msra.mxu0 %v788_v14  ;;  %805 = vmatpush3.bf16.msra.mxu1 %v788_v14  ;;  %v22_v30 = vld [vmem:[%s1089_s0 + $0x40] sm:$0xff]  ;;  %v23_v32 = vld [vmem:[%s1089_s0 + $0x48] sm:$0xff]  ;;  %v40_v33 = vld [vmem:[%s1089_s0 + $0xd0] sm:$0xff] }
  0x11   :  { %793 = vmatprep.subr.bf16.mxu0 %v792_v19  ;;  %802 = vmatprep.subr.bf16.mxu1 %v792_v19  ;;  %v24_v34 = vld [vmem:[%s1089_s0 + $0x50] sm:$0xff]  ;;  %v41_v35 = vld [vmem:[%s1089_s0 + $0xd8] sm:$0xff]  ;;  %v42_v37 = vld [vmem:[%s1089_s0 + $0xe0] sm:$0xff] }
  0x12   :  { %107 = vperm.xlu1 %814, %v34_v17   ;;  %59 = vperm.xlu0 %813, %v18_v18   ;;  %v25_v36 = vld [vmem:[%s1089_s0 + $0x58] sm:$0xff]  ;;  %v26_v38 = vld [vmem:[%s1089_s0 + $0x60] sm:$0xff]  ;;  %v43_v39 = vld [vmem:[%s1089_s0 + $0xe8] sm:$0xff] }
  0x13   :  { %v27_v40 = vld [vmem:[%s1089_s0 + $0x68] sm:$0xff]  ;;  %v44_v41 = vld [vmem:[%s1089_s0 + $0xf0] sm:$0xff]  ;;  %v45_v43 = vld [vmem:[%s1089_s0 + $0xf8] sm:$0xff] }
  0x14   :  { %795 = vmatpush3.bf16.msra.mxu0 %v792_v19  ;;  %806 = vmatpush3.bf16.msra.mxu1 %v792_v19  ;;  %v28_v42 = vld [vmem:[%s1089_s0 + $0x70] sm:$0xff]  ;;  %v29_v44 = vld [vmem:[%s1089_s0 + $0x78] sm:$0xff]  ;;  %s841_s0 = smov [#allocation2]  }
  0x15   :  { %797 = vmatprep.subr.bf16.mxu0 %v796_v24  ;;  %803 = vmatprep.subr.bf16.mxu1 %v796_v24  ;;  %s605_s3 = sshll.u32 %s841_s0, 4  ;;  %s606_s3 = int_to_ptr.vmem [resolvable:$true] %s605_s3 }
  0x16   :  { %110 = vperm.xlu1 %814, %v35_v22   ;;  %62 = vperm.xlu0 %813, %v19_v23   ;;  %s815_s4 = scalar_lea.vmem %s606_s3, 4096  ;;  %p820_p1 = scmp.lt.s32.totalorder %s606_s3, %s606_s3 }
  0x17   :  { %p816_p0 = scmp.ne.s32.totalorder %s606_s3, %s815_s4  ;;  %p821_p2 = scmp.lt.s32.totalorder %s815_s4, %s815_s4 }
  0x18   :  { %799 = vmatpush3.bf16.msra.mxu0 %v796_v24  ;;  %807 = vmatpush3.bf16.msra.mxu1 %v796_v24 }
  0x19   :  { %p822_p3 = por %p821_p2, %p820_p1 }
  0x1a   :  { %113 = vperm.xlu1 %814, %v36_v25   ;;  %65 = vperm.xlu0 %813, %v20_v26  }
  0x1b   :  { %p823_p4 = pnand %p822_p3, %p816_p0 }
  0x1e   :  { %116 = vperm.xlu1 %814, %v37_v27   ;;  %68 = vperm.xlu0 %813, %v21_v28  }
  0x22   :  { %119 = vperm.xlu1 %814, %v38_v29   ;;  %71 = vperm.xlu0 %813, %v22_v30  }
  0x26   :  { %122 = vperm.xlu1 %814, %v39_v31   ;;  %74 = vperm.xlu0 %813, %v23_v32  }
  0x2a   :  { %125 = vperm.xlu1 %814, %v40_v33   ;;  %77 = vperm.xlu0 %813, %v24_v34  }
  0x2e   :  { %128 = vperm.xlu1 %814, %v41_v35   ;;  %80 = vperm.xlu0 %813, %v25_v36  }
  0x32   :  { %131 = vperm.xlu1 %814, %v42_v37   ;;  %83 = vperm.xlu0 %813, %v26_v38  }
  0x36   :  { %134 = vperm.xlu1 %814, %v43_v39   ;;  %86 = vperm.xlu0 %813, %v27_v40  }
  0x3a   :  { %137 = vperm.xlu1 %814, %v44_v41   ;;  %89 = vperm.xlu0 %813, %v28_v42  }
  0x3e   :  { %140 = vperm.xlu1 %814, %v45_v43   ;;  %92 = vperm.xlu0 %813, %v29_v44  }
  0x81   :  { %v51_v47 = vpop.permute.xlu1 %50  ;;  %v48_v48 = vpop.permute.xlu0 %47 }
  0x82   :  { %vm143_vm1 = vcmp.eq.s32.totalorder %v979_v46, %v51_v47  ;;  %vm142_vm2 = vcmp.eq.s32.totalorder %v979_v46, %v48_v48 }
  0x83   :  { %v617_v50 = vsel %vm143_vm1, 1.0, %v840_v49  ;;  %v616_v51 = vsel %vm142_vm2, 1.0, %v840_v49 }
  0x84   :  { %736 = vmatprep.mubr.msk.f32.mxu0 %vm246_vm0, %v616_v51 }
  0x85   :  { %v99_v52 = vpop.permute.xlu1 %98  ;;  %v96_v53 = vpop.permute.xlu0 %95  ;;  %737 = vmatmul.mubr.msk.f32.vlgmr.msra.gmra.mrb[0].mxu0 %vm246_vm0, %v617_v50 }
  0x86   :  { %vm159_vm3 = vcmp.eq.s32.totalorder %v979_v46, %v99_v52  ;;  %vm158_vm4 = vcmp.eq.s32.totalorder %v979_v46, %v96_v53 }
  0x87   :  { %v633_v54 = vsel %vm159_vm3, 1.0, %v840_v49  ;;  %v632_v55 = vsel %vm158_vm4, 1.0, %v840_v49 }
  0x88   :  { %760 = vmatprep.mubr.msk.f32.mxu1 %vm246_vm0, %v632_v55 }
  0x89   :  { %v102_v56 = vpop.permute.xlu1 %101  ;;  %v54_v57 = vpop.permute.xlu0 %53  ;;  %761 = vmatmul.mubr.msk.f32.vlgmr.msra.gmra.mrb[0].mxu1 %vm246_vm0, %v633_v54 }
  0x8a   :  { %vm160_vm5 = vcmp.eq.s32.totalorder %v979_v46, %v102_v56  ;;  %vm144_vm6 = vcmp.eq.s32.totalorder %v979_v46, %v54_v57 }
  0x8b   :  { %v634_v58 = vsel %vm160_vm5, 1.0, %v840_v49  ;;  %v618_v59 = vsel %vm144_vm6, 1.0, %v840_v49 }
  0x8c   :  { %739 = vmatprep.mubr.msk.f32.mxu0 %vm246_vm0, %v618_v59  ;;  %763 = vmatprep.mubr.msk.f32.mxu1 %vm246_vm0, %v634_v58 }
  0x8d   :  { %v105_v60 = vpop.permute.xlu1 %104  ;;  %v57_v61 = vpop.permute.xlu0 %56 }
  0x8e   :  { %vm161_vm7 = vcmp.eq.s32.totalorder %v979_v46, %v105_v60  ;;  %vm145_vm8 = vcmp.eq.s32.totalorder %v979_v46, %v57_v61 }
  0x8f   :  { %v635_v62 = vsel %vm161_vm7, 1.0, %v840_v49  ;;  %v619_v63 = vsel %vm145_vm8, 1.0, %v840_v49 }
  0x90   :  { %740 = vmatmul.mubr.msk.f32.gmra.mrb[2].mxu0 %vm246_vm0, %v619_v63  ;;  %764 = vmatmul.mubr.msk.f32.gmra.mrb[2].mxu1 %vm246_vm0, %v635_v62 }
  0x91   :  { %v108_v0 = vpop.permute.xlu1 %107  ;;  %v60_v1 = vpop.permute.xlu0 %59 }
  0x92   :  { %vm162_vm9 = vcmp.eq.s32.totalorder %v979_v46, %v108_v0  ;;  %vm146_vm10 = vcmp.eq.s32.totalorder %v979_v46, %v60_v1 }
  0x93   :  { %v636_v2 = vsel %vm162_vm9, 1.0, %v840_v49  ;;  %v620_v3 = vsel %vm146_vm10, 1.0, %v840_v49 }
  0x94   :  { %742 = vmatprep.mubr.msk.f32.mxu0 %vm246_vm0, %v620_v3  ;;  %766 = vmatprep.mubr.msk.f32.mxu1 %vm246_vm0, %v636_v2 }
  0x95   :  { %v111_v4 = vpop.permute.xlu1 %110  ;;  %v63_v5 = vpop.permute.xlu0 %62 }
  0x96   :  { %vm163_vm11 = vcmp.eq.s32.totalorder %v979_v46, %v111_v4  ;;  %vm147_vm12 = vcmp.eq.s32.totalorder %v979_v46, %v63_v5 }
  0x97   :  { %v637_v6 = vsel %vm163_vm11, 1.0, %v840_v49  ;;  %v621_v7 = vsel %vm147_vm12, 1.0, %v840_v49 }
  0x98   :  { %743 = vmatmul.mubr.msk.f32.gmra.mrb[4].mxu0 %vm246_vm0, %v621_v7  ;;  %767 = vmatmul.mubr.msk.f32.gmra.mrb[4].mxu1 %vm246_vm0, %v637_v6 }
  0x99   :  { %v114_v8 = vpop.permute.xlu1 %113  ;;  %v66_v9 = vpop.permute.xlu0 %65 }
  0x9a   :  { %vm164_vm13 = vcmp.eq.s32.totalorder %v979_v46, %v114_v8  ;;  %vm148_vm14 = vcmp.eq.s32.totalorder %v979_v46, %v66_v9 }
  0x9b   :  { %v638_v10 = vsel %vm164_vm13, 1.0, %v840_v49  ;;  %v622_v11 = vsel %vm148_vm14, 1.0, %v840_v49 }
  0x9c   :  { %745 = vmatprep.mubr.msk.f32.mxu0 %vm246_vm0, %v622_v11  ;;  %769 = vmatprep.mubr.msk.f32.mxu1 %vm246_vm0, %v638_v10 }
  0x9d   :  { %v117_v12 = vpop.permute.xlu1 %116  ;;  %v69_v13 = vpop.permute.xlu0 %68 }
  0x9e   :  { %vm165_vm15 = vcmp.eq.s32.totalorder %v979_v46, %v117_v12  ;;  %vm149_vm1 = vcmp.eq.s32.totalorder %v979_v46, %v69_v13 }
  0x9f   :  { %v639_v14 = vsel %vm165_vm15, 1.0, %v840_v49  ;;  %v623_v15 = vsel %vm149_vm1, 1.0, %v840_v49 }
  0xa0   :  { %746 = vmatmul.mubr.msk.f32.gmra.mrb[6].mxu0 %vm246_vm0, %v623_v15  ;;  %770 = vmatmul.mubr.msk.f32.gmra.mrb[6].mxu1 %vm246_vm0, %v639_v14 }
  0xa1   :  { %v120_v16 = vpop.permute.xlu1 %119  ;;  %v72_v17 = vpop.permute.xlu0 %71 }
  0xa2   :  { %vm166_vm2 = vcmp.eq.s32.totalorder %v979_v46, %v120_v16  ;;  %vm150_vm3 = vcmp.eq.s32.totalorder %v979_v46, %v72_v17 }
  0xa3   :  { %v640_v18 = vsel %vm166_vm2, 1.0, %v840_v49  ;;  %v624_v19 = vsel %vm150_vm3, 1.0, %v840_v49 }
  0xa4   :  { %748 = vmatprep.mubr.msk.f32.mxu0 %vm246_vm0, %v624_v19  ;;  %772 = vmatprep.mubr.msk.f32.mxu1 %vm246_vm0, %v640_v18 }
  0xa5   :  { %v123_v20 = vpop.permute.xlu1 %122  ;;  %v75_v21 = vpop.permute.xlu0 %74 }
  0xa6   :  { %vm167_vm4 = vcmp.eq.s32.totalorder %v979_v46, %v123_v20  ;;  %vm151_vm5 = vcmp.eq.s32.totalorder %v979_v46, %v75_v21 }
  0xa7   :  { %v641_v22 = vsel %vm167_vm4, 1.0, %v840_v49  ;;  %v625_v23 = vsel %vm151_vm5, 1.0, %v840_v49 }
  0xa8   :  { %749 = vmatmul.mubr.msk.f32.gmra.mrb[8].mxu0 %vm246_vm0, %v625_v23  ;;  %773 = vmatmul.mubr.msk.f32.gmra.mrb[8].mxu1 %vm246_vm0, %v641_v22 }
  0xa9   :  { %v126_v24 = vpop.permute.xlu1 %125  ;;  %v78_v25 = vpop.permute.xlu0 %77 }
  0xaa   :  { %vm168_vm6 = vcmp.eq.s32.totalorder %v979_v46, %v126_v24  ;;  %vm152_vm7 = vcmp.eq.s32.totalorder %v979_v46, %v78_v25 }
  0xab   :  { %v642_v26 = vsel %vm168_vm6, 1.0, %v840_v49  ;;  %v626_v27 = vsel %vm152_vm7, 1.0, %v840_v49 }
  0xac   :  { %751 = vmatprep.mubr.msk.f32.mxu0 %vm246_vm0, %v626_v27  ;;  %775 = vmatprep.mubr.msk.f32.mxu1 %vm246_vm0, %v642_v26 }
  0xad   :  { %v129_v28 = vpop.permute.xlu1 %128  ;;  %v81_v29 = vpop.permute.xlu0 %80 }
  0xae   :  { %vm169_vm8 = vcmp.eq.s32.totalorder %v979_v46, %v129_v28  ;;  %vm153_vm9 = vcmp.eq.s32.totalorder %v979_v46, %v81_v29 }
  0xaf   :  { %v643_v30 = vsel %vm169_vm8, 1.0, %v840_v49  ;;  %v627_v31 = vsel %vm153_vm9, 1.0, %v840_v49 }
  0xb0   :  { %752 = vmatmul.mubr.msk.f32.gmra.mrb[10].mxu0 %vm246_vm0, %v627_v31  ;;  %776 = vmatmul.mubr.msk.f32.gmra.mrb[10].mxu1 %vm246_vm0, %v643_v30 }
  0xb1   :  { %v132_v32 = vpop.permute.xlu1 %131  ;;  %v84_v33 = vpop.permute.xlu0 %83 }
  0xb2   :  { %vm170_vm10 = vcmp.eq.s32.totalorder %v979_v46, %v132_v32  ;;  %vm154_vm11 = vcmp.eq.s32.totalorder %v979_v46, %v84_v33 }
  0xb3   :  { %v644_v34 = vsel %vm170_vm10, 1.0, %v840_v49  ;;  %v628_v35 = vsel %vm154_vm11, 1.0, %v840_v49 }
  0xb4   :  { %754 = vmatprep.mubr.msk.f32.mxu0 %vm246_vm0, %v628_v35  ;;  %778 = vmatprep.mubr.msk.f32.mxu1 %vm246_vm0, %v644_v34 }
  0xb5   :  { %v135_v36 = vpop.permute.xlu1 %134  ;;  %v87_v37 = vpop.permute.xlu0 %86 }
  0xb6   :  { %vm171_vm12 = vcmp.eq.s32.totalorder %v979_v46, %v135_v36  ;;  %vm155_vm13 = vcmp.eq.s32.totalorder %v979_v46, %v87_v37 }
  0xb7   :  { %v645_v38 = vsel %vm171_vm12, 1.0, %v840_v49  ;;  %v629_v39 = vsel %vm155_vm13, 1.0, %v840_v49 }
  0xb8   :  { %755 = vmatmul.mubr.msk.f32.gmra.mrb[12].mxu0 %vm246_vm0, %v629_v39  ;;  %779 = vmatmul.mubr.msk.f32.gmra.mrb[12].mxu1 %vm246_vm0, %v645_v38 }
  0xb9   :  { %v138_v40 = vpop.permute.xlu1 %137  ;;  %v90_v41 = vpop.permute.xlu0 %89 }
  0xba   :  { %vm172_vm14 = vcmp.eq.s32.totalorder %v979_v46, %v138_v40  ;;  %vm156_vm15 = vcmp.eq.s32.totalorder %v979_v46, %v90_v41 }
  0xbb   :  { %v646_v42 = vsel %vm172_vm14, 1.0, %v840_v49  ;;  %v630_v43 = vsel %vm156_vm15, 1.0, %v840_v49 }
  0xbc   :  { %757 = vmatprep.mubr.msk.f32.mxu0 %vm246_vm0, %v630_v43  ;;  %781 = vmatprep.mubr.msk.f32.mxu1 %vm246_vm0, %v646_v42 }
  0xbd   :  { %v141_v44 = vpop.permute.xlu1 %140  ;;  %v93_v45 = vpop.permute.xlu0 %92 }
  0xbe   :  { %vm173_vm1 = vcmp.eq.s32.totalorder %v979_v46, %v141_v44  ;;  %vm157_vm2 = vcmp.eq.s32.totalorder %v979_v46, %v93_v45 }
  0xbf   :  { %v647_v47 = vsel %vm173_vm1, 1.0, %v840_v49  ;;  %v631_v48 = vsel %vm157_vm2, 1.0, %v840_v49 }
  0xc0   :  { %758 = vmatmul.mubr.msk.f32.gmra.mrb[14].mxu0 %vm246_vm0, %v631_v48  ;;  %782 = vmatmul.mubr.msk.f32.gmra.mrb[14].mxu1 %vm246_vm0, %v647_v47 }
 0x158   :  { %v738_v50 = vpop.f32.mrb[0].mxu0 }
 0x159   :  { %569 = vst [vmem:[#allocation2 + $0x8] sm:$0xff] %v738_v50  ;;  %v409_v51 = vpop.f32.mrb[1].mxu0 }
 0x15a   :  { %568 = vst [vmem:[#allocation2] sm:$0xff] %v409_v51 }
 0x15c   :  { %v762_v52 = vpop.f32.mrb[0].mxu1 }
 0x15d   :  { %585 = vst [vmem:[#allocation2 + $0x88] sm:$0xff] %v762_v52  ;;  %v489_v53 = vpop.f32.mrb[1].mxu1 }
 0x15e   :  { %584 = vst [vmem:[#allocation2 + $0x80] sm:$0xff] %v489_v53 }
 0x163   :  { %v741_v54 = vpop.f32.mrb[2].mxu0  ;;  %v765_v55 = vpop.f32.mrb[2].mxu1 }
 0x164   :  { %571 = vst [vmem:[#allocation2 + $0x18] sm:$0xff] %v741_v54  ;;  %587 = vst [vmem:[#allocation2 + $0x98] sm:$0xff] %v765_v55  ;;  %v419_v46 = vpop.f32.mrb[3].mxu0  ;;  %v499_v56 = vpop.f32.mrb[3].mxu1 }
 0x165   :  { %570 = vst [vmem:[#allocation2 + $0x10] sm:$0xff] %v419_v46  ;;  %586 = vst [vmem:[#allocation2 + $0x90] sm:$0xff] %v499_v56 }
 0x16b   :  { %v744_v49 = vpop.f32.mrb[4].mxu0  ;;  %v768_v57 = vpop.f32.mrb[4].mxu1 }
 0x16c   :  { %573 = vst [vmem:[#allocation2 + $0x28] sm:$0xff] %v744_v49  ;;  %589 = vst [vmem:[#allocation2 + $0xa8] sm:$0xff] %v768_v57  ;;  %v429_v58 = vpop.f32.mrb[5].mxu0  ;;  %v509_v59 = vpop.f32.mrb[5].mxu1 }
 0x16d   :  { %572 = vst [vmem:[#allocation2 + $0x20] sm:$0xff] %v429_v58  ;;  %588 = vst [vmem:[#allocation2 + $0xa0] sm:$0xff] %v509_v59 }
 0x173   :  { %v747_v60 = vpop.f32.mrb[6].mxu0  ;;  %v771_v61 = vpop.f32.mrb[6].mxu1 }
 0x174   :  { %575 = vst [vmem:[#allocation2 + $0x38] sm:$0xff] %v747_v60  ;;  %591 = vst [vmem:[#allocation2 + $0xb8] sm:$0xff] %v771_v61  ;;  %v439_v62 = vpop.f32.mrb[7].mxu0  ;;  %v519_v63 = vpop.f32.mrb[7].mxu1 }
 0x175   :  { %574 = vst [vmem:[#allocation2 + $0x30] sm:$0xff] %v439_v62  ;;  %590 = vst [vmem:[#allocation2 + $0xb0] sm:$0xff] %v519_v63 }
 0x17b   :  { %v750_v0 = vpop.f32.mrb[8].mxu0  ;;  %v774_v1 = vpop.f32.mrb[8].mxu1 }
 0x17c   :  { %577 = vst [vmem:[#allocation2 + $0x48] sm:$0xff] %v750_v0  ;;  %593 = vst [vmem:[#allocation2 + $0xc8] sm:$0xff] %v774_v1  ;;  %v449_v2 = vpop.f32.mrb[9].mxu0  ;;  %v529_v3 = vpop.f32.mrb[9].mxu1 }
 0x17d   :  { %576 = vst [vmem:[#allocation2 + $0x40] sm:$0xff] %v449_v2  ;;  %592 = vst [vmem:[#allocation2 + $0xc0] sm:$0xff] %v529_v3 }
 0x183   :  { %v753_v4 = vpop.f32.mrb[10].mxu0  ;;  %v777_v5 = vpop.f32.mrb[10].mxu1 }
 0x184   :  { %579 = vst [vmem:[#allocation2 + $0x58] sm:$0xff] %v753_v4  ;;  %595 = vst [vmem:[#allocation2 + $0xd8] sm:$0xff] %v777_v5  ;;  %v459_v6 = vpop.f32.mrb[11].mxu0  ;;  %v539_v7 = vpop.f32.mrb[11].mxu1 }
 0x185   :  { %578 = vst [vmem:[#allocation2 + $0x50] sm:$0xff] %v459_v6  ;;  %594 = vst [vmem:[#allocation2 + $0xd0] sm:$0xff] %v539_v7 }
 0x18b   :  { %v756_v8 = vpop.f32.mrb[12].mxu0  ;;  %v780_v9 = vpop.f32.mrb[12].mxu1 }
 0x18c   :  { %581 = vst [vmem:[#allocation2 + $0x68] sm:$0xff] %v756_v8  ;;  %597 = vst [vmem:[#allocation2 + $0xe8] sm:$0xff] %v780_v9  ;;  %v469_v10 = vpop.f32.mrb[13].mxu0  ;;  %v549_v11 = vpop.f32.mrb[13].mxu1 }
 0x18d   :  { %580 = vst [vmem:[#allocation2 + $0x60] sm:$0xff] %v469_v10  ;;  %596 = vst [vmem:[#allocation2 + $0xe0] sm:$0xff] %v549_v11 }
 0x193   :  { %v759_v12 = vpop.f32.mrb[14].mxu0  ;;  %v783_v13 = vpop.f32.mrb[14].mxu1 }
 0x194   :  { %583 = vst [vmem:[#allocation2 + $0x78] sm:$0xff] %v759_v12  ;;  %599 = vst [vmem:[#allocation2 + $0xf8] sm:$0xff] %v783_v13  ;;  %v479_v14 = vpop.f32.mrb[15].mxu0  ;;  %v559_v15 = vpop.f32.mrb[15].mxu1 }
 0x195   :  { %582 = vst [vmem:[#allocation2 + $0x70] sm:$0xff] %v479_v14  ;;  %598 = vst [vmem:[#allocation2 + $0xf0] sm:$0xff] %v559_v15 }
 0x196   :  { %826 = shalt.err (!%p823_p4)
}
 0x197   :  { %s827_s7 = scalar_lea.hbm %s1091_s2, 4096 }
 0x198   :  { %p828_p5 = scmp.ne.s32.totalorder %s1091_s2, %s827_s7  ;;  %p831_p6 = scmp.lt.u32.totalorder %s827_s7, %s1091_s2 }
 0x19a   :  { %p833_p7 = pnand %p831_p6, %p828_p5 }
 0x19c   :  { %836 = shalt.err (!%p833_p7)
}
 0x19d   :  { %s842_s12 = smov 128   ;;  %s843_s13 = smov 8  }
 0x19e   :  { %611 = dma.vmem_to_hbm [thread:$0]  %s606_s3, 4096, %s1091_s2, [#allocation3], %s842_s12, %s842_s12, %s843_s13  }
 0x19f   :  { %837 = dma.done.wait [#allocation3], 4096  }
 0x1a0   :  { %838 = vsyncadd [#allocation3], 4294963200 }
 0x1a1   :  { %615 = vsyncpa [#allocation3], 1 }

// kernel: tpu_custom_call.1
= control target key start
LH: loop header
LB: loop body
LE: loop exit
PB: predicated region body
PF: predicated region fallthrough
CT: control target
= control target key end

     0   :  { %v839_v2 = vmov 0   ;;  %s1089_s0 = inlined_call_operand.vmem [shape: s32[256,1], index: 0, kind: input, shape index: {}]   ;;  %s1090_s1 = inlined_call_operand.vmem [shape: f32[64,128], index: 1, kind: input, shape index: {}]   ;;  %s1091_s2 = inlined_call_operand.hbm [shape: f32[256,128], index: 2, kind: output, shape index: {}]  }
   0x1   :  { %v15_v0 = vld [vmem:[%s1089_s0 + $0x8] sm:$0xff]  ;;  %v14_v1 = vld [vmem:[%s1089_s0] sm:$0xff]  ;;  %814 = vset.pattern.permute.xlu1 %v839_v2  ;;  %813 = vset.pattern.permute.xlu0 %v839_v2  ;;  %v32_v5 = vld [vmem:[%s1089_s0 + $0x90] sm:$0xff] }
   0x2   :  { %50 = vperm.xlu1 %814, %v15_v0   ;;  %47 = vperm.xlu0 %813, %v14_v1   ;;  %v31_v3 = vld [vmem:[%s1089_s0 + $0x88] sm:$0xff]  ;;  %v30_v4 = vld [vmem:[%s1089_s0 + $0x80] sm:$0xff]  ;;  %v16_v6 = vld [vmem:[%s1089_s0 + $0x10] sm:$0xff] }
   0x3   :  { %v33_v7 = vld [vmem:[%s1089_s0 + $0x98] sm:$0xff]  ;;  %v238_v9 = vld [vmem:[%s1090_s1] sm:$0xff]  ;;  %v239_v10 = vld [vmem:[%s1090_s1 + $0x8] sm:$0xff] }
   0x4   :  { %v17_v8 = vld [vmem:[%s1089_s0 + $0x18] sm:$0xff]  ;;  %v240_v11 = vld [vmem:[%s1090_s1 + $0x10] sm:$0xff]  ;;  %v784_v13 = vpack.c.bf16 %v239_v10, %v238_v9 }
   0x5   :  { %v241_v12 = vld [vmem:[%s1090_s1 + $0x18] sm:$0xff] }
   0x6   :  { %98 = vperm.xlu1 %814, %v31_v3   ;;  %95 = vperm.xlu0 %813, %v30_v4   ;;  %v788_v14 = vpack.c.bf16 %v241_v12, %v240_v11 }
   0xa   :  { %101 = vperm.xlu1 %814, %v32_v5   ;;  %53 = vperm.xlu0 %813, %v16_v6  }
   0xb   :  { %7 = vsyncpa [#allocation3], 0  ;;  %v242_v15 = vld [vmem:[%s1090_s1 + $0x20] sm:$0xff]  ;;  %v243_v16 = vld [vmem:[%s1090_s1 + $0x28] sm:$0xff]  ;;  %785 = vmatprep.subr.bf16.mxu0 %v784_v13  ;;  %800 = vmatprep.subr.bf16.mxu1 %v784_v13  ;;  %v12_v45 = vlaneseq  ;;  %vm246_vm0 = vcmask 523264   ;;  %v840_v49 = vmov 0.0  }
   0xc   :  { %v34_v17 = vld [vmem:[%s1089_s0 + $0xa0] sm:$0xff]  ;;  %787 = vmatpush3.bf16.msra.mxu0 %v784_v13  ;;  %804 = vmatpush3.bf16.msra.mxu1 %v784_v13  ;;  %v792_v19 = vpack.c.bf16 %v243_v16, %v242_v15  ;;  %v244_v20 = vld [vmem:[%s1090_s1 + $0x30] sm:$0xff]  ;;  %v245_v21 = vld [vmem:[%s1090_s1 + $0x38] sm:$0xff] }
   0xd   :  { %v18_v18 = vld [vmem:[%s1089_s0 + $0x20] sm:$0xff]  ;;  %789 = vmatprep.subr.bf16.mxu0 %v788_v14  ;;  %801 = vmatprep.subr.bf16.mxu1 %v788_v14  ;;  %v35_v22 = vld [vmem:[%s1089_s0 + $0xa8] sm:$0xff]  ;;  %v796_v24 = vpack.c.bf16 %v245_v21, %v244_v20  ;;  %v36_v25 = vld [vmem:[%s1089_s0 + $0xb0] sm:$0xff]  ;;  %v979_v46 = vand.u32 127, %v12_v45 }
   0xe   :  { %104 = vperm.xlu1 %814, %v33_v7   ;;  %56 = vperm.xlu0 %813, %v17_v8   ;;  %v19_v23 = vld [vmem:[%s1089_s0 + $0x28] sm:$0xff]  ;;  %v20_v26 = vld [vmem:[%s1089_s0 + $0x30] sm:$0xff]  ;;  %v37_v27 = vld [vmem:[%s1089_s0 + $0xb8] sm:$0xff] }
   0xf   :  { %v21_v28 = vld [vmem:[%s1089_s0 + $0x38] sm:$0xff]  ;;  %v38_v29 = vld [vmem:[%s1089_s0 + $0xc0] sm:$0xff]  ;;  %v39_v31 = vld [vmem:[%s1089_s0 + $0xc8] sm:$0xff] }
  0x10   :  { %791 = vmatpush3.bf16.msra.mxu0 %v788_v14  ;;  %805 = vmatpush3.bf16.msra.mxu1 %v788_v14  ;;  %v22_v30 = vld [vmem:[%s1089_s0 + $0x40] sm:$0xff]  ;;  %v23_v32 = vld [vmem:[%s1089_s0 + $0x48] sm:$0xff]  ;;  %v40_v33 = vld [vmem:[%s1089_s0 + $0xd0] sm:$0xff] }
  0x11   :  { %793 = vmatprep.subr.bf16.mxu0 %v792_v19  ;;  %802 = vmatprep.subr.bf16.mxu1 %v792_v19  ;;  %v24_v34 = vld [vmem:[%s1089_s0 + $0x50] sm:$0xff]  ;;  %v41_v35 = vld [vmem:[%s1089_s0 + $0xd8] sm:$0xff]  ;;  %v42_v37 = vld [vmem:[%s1089_s0 + $0xe0] sm:$0xff] }
  0x12   :  { %107 = vperm.xlu1 %814, %v34_v17   ;;  %59 = vperm.xlu0 %813, %v18_v18   ;;  %v25_v36 = vld [vmem:[%s1089_s0 + $0x58] sm:$0xff]  ;;  %v26_v38 = vld [vmem:[%s1089_s0 + $0x60] sm:$0xff]  ;;  %v43_v39 = vld [vmem:[%s1089_s0 + $0xe8] sm:$0xff] }
  0x13   :  { %v27_v40 = vld [vmem:[%s1089_s0 + $0x68] sm:$0xff]  ;;  %v44_v41 = vld [vmem:[%s1089_s0 + $0xf0] sm:$0xff]  ;;  %v45_v43 = vld [vmem:[%s1089_s0 + $0xf8] sm:$0xff] }
  0x14   :  { %795 = vmatpush3.bf16.msra.mxu0 %v792_v19  ;;  %806 = vmatpush3.bf16.msra.mxu1 %v792_v19  ;;  %v28_v42 = vld [vmem:[%s1089_s0 + $0x70] sm:$0xff]  ;;  %v29_v44 = vld [vmem:[%s1089_s0 + $0x78] sm:$0xff]  ;;  %s841_s0 = smov [#allocation2]  }
  0x15   :  { %797 = vmatprep.subr.bf16.mxu0 %v796_v24  ;;  %803 = vmatprep.subr.bf16.mxu1 %v796_v24  ;;  %s605_s3 = sshll.u32 %s841_s0, 4  ;;  %s606_s3 = int_to_ptr.vmem [resolvable:$true] %s605_s3 }
  0x16   :  { %110 = vperm.xlu1 %814, %v35_v22   ;;  %62 = vperm.xlu0 %813, %v19_v23   ;;  %s815_s4 = scalar_lea.vmem %s606_s3, 4096  ;;  %p820_p1 = scmp.lt.s32.totalorder %s606_s3, %s606_s3 }
  0x17   :  { %p816_p0 = scmp.ne.s32.totalorder %s606_s3, %s815_s4  ;;  %p821_p2 = scmp.lt.s32.totalorder %s815_s4, %s815_s4 }
  0x18   :  { %799 = vmatpush3.bf16.msra.mxu0 %v796_v24  ;;  %807 = vmatpush3.bf16.msra.mxu1 %v796_v24 }
  0x19   :  { %p822_p3 = por %p821_p2, %p820_p1 }
  0x1a   :  { %113 = vperm.xlu1 %814, %v36_v25   ;;  %65 = vperm.xlu0 %813, %v20_v26  }
  0x1b   :  { %p823_p4 = pnand %p822_p3, %p816_p0 }
  0x1e   :  { %116 = vperm.xlu1 %814, %v37_v27   ;;  %68 = vperm.xlu0 %813, %v21_v28  }
  0x22   :  { %119 = vperm.xlu1 %814, %v38_v29   ;;  %71 = vperm.xlu0 %813, %v22_v30  }
  0x26   :  { %122 = vperm.xlu1 %814, %v39_v31   ;;  %74 = vperm.xlu0 %813, %v23_v32  }
  0x2a   :  { %125 = vperm.xlu1 %814, %v40_v33   ;;  %77 = vperm.xlu0 %813, %v24_v34  }
  0x2e   :  { %128 = vperm.xlu1 %814, %v41_v35   ;;  %80 = vperm.xlu0 %813, %v25_v36  }
  0x32   :  { %131 = vperm.xlu1 %814, %v42_v37   ;;  %83 = vperm.xlu0 %813, %v26_v38  }
  0x36   :  { %134 = vperm.xlu1 %814, %v43_v39   ;;  %86 = vperm.xlu0 %813, %v27_v40  }
  0x3a   :  { %137 = vperm.xlu1 %814, %v44_v41   ;;  %89 = vperm.xlu0 %813, %v28_v42  }
  0x3e   :  { %140 = vperm.xlu1 %814, %v45_v43   ;;  %92 = vperm.xlu0 %813, %v29_v44  }
  0x81   :  { %v51_v47 = vpop.permute.xlu1 %50  ;;  %v48_v48 = vpop.permute.xlu0 %47 }
  0x82   :  { %vm143_vm1 = vcmp.eq.s32.totalorder %v979_v46, %v51_v47  ;;  %vm142_vm2 = vcmp.eq.s32.totalorder %v979_v46, %v48_v48 }
  0x83   :  { %v617_v50 = vsel %vm143_vm1, 1.0, %v840_v49  ;;  %v616_v51 = vsel %vm142_vm2, 1.0, %v840_v49 }
  0x84   :  { %736 = vmatprep.mubr.msk.f32.mxu0 %vm246_vm0, %v616_v51 }
  0x85   :  { %v99_v52 = vpop.permute.xlu1 %98  ;;  %v96_v53 = vpop.permute.xlu0 %95  ;;  %737 = vmatmul.mubr.msk.f32.vlgmr.msra.gmra.mrb[0].mxu0 %vm246_vm0, %v617_v50 }
  0x86   :  { %vm159_vm3 = vcmp.eq.s32.totalorder %v979_v46, %v99_v52  ;;  %vm158_vm4 = vcmp.eq.s32.totalorder %v979_v46, %v96_v53 }
  0x87   :  { %v633_v54 = vsel %vm159_vm3, 1.0, %v840_v49  ;;  %v632_v55 = vsel %vm158_vm4, 1.0, %v840_v49 }
  0x88   :  { %760 = vmatprep.mubr.msk.f32.mxu1 %vm246_vm0, %v632_v55 }
  0x89   :  { %v102_v56 = vpop.permute.xlu1 %101  ;;  %v54_v57 = vpop.permute.xlu0 %53  ;;  %761 = vmatmul.mubr.msk.f32.vlgmr.msra.gmra.mrb[0].mxu1 %vm246_vm0, %v633_v54 }
  0x8a   :  { %vm160_vm5 = vcmp.eq.s32.totalorder %v979_v46, %v102_v56  ;;  %vm144_vm6 = vcmp.eq.s32.totalorder %v979_v46, %v54_v57 }
  0x8b   :  { %v634_v58 = vsel %vm160_vm5, 1.0, %v840_v49  ;;  %v618_v59 = vsel %vm144_vm6, 1.0, %v840_v49 }
  0x8c   :  { %739 = vmatprep.mubr.msk.f32.mxu0 %vm246_vm0, %v618_v59  ;;  %763 = vmatprep.mubr.msk.f32.mxu1 %vm246_vm0, %v634_v58 }
  0x8d   :  { %v105_v60 = vpop.permute.xlu1 %104  ;;  %v57_v61 = vpop.permute.xlu0 %56 }
  0x8e   :  { %vm161_vm7 = vcmp.eq.s32.totalorder %v979_v46, %v105_v60  ;;  %vm145_vm8 = vcmp.eq.s32.totalorder %v979_v46, %v57_v61 }
  0x8f   :  { %v635_v62 = vsel %vm161_vm7, 1.0, %v840_v49  ;;  %v619_v63 = vsel %vm145_vm8, 1.0, %v840_v49 }
  0x90   :  { %740 = vmatmul.mubr.msk.f32.gmra.mrb[2].mxu0 %vm246_vm0, %v619_v63  ;;  %764 = vmatmul.mubr.msk.f32.gmra.mrb[2].mxu1 %vm246_vm0, %v635_v62 }
  0x91   :  { %v108_v0 = vpop.permute.xlu1 %107  ;;  %v60_v1 = vpop.permute.xlu0 %59 }
  0x92   :  { %vm162_vm9 = vcmp.eq.s32.totalorder %v979_v46, %v108_v0  ;;  %vm146_vm10 = vcmp.eq.s32.totalorder %v979_v46, %v60_v1 }
  0x93   :  { %v636_v2 = vsel %vm162_vm9, 1.0, %v840_v49  ;;  %v620_v3 = vsel %vm146_vm10, 1.0, %v840_v49 }
  0x94   :  { %742 = vmatprep.mubr.msk.f32.mxu0 %vm246_vm0, %v620_v3  ;;  %766 = vmatprep.mubr.msk.f32.mxu1 %vm246_vm0, %v636_v2 }
  0x95   :  { %v111_v4 = vpop.permute.xlu1 %110  ;;  %v63_v5 = vpop.permute.xlu0 %62 }
  0x96   :  { %vm163_vm11 = vcmp.eq.s32.totalorder %v979_v46, %v111_v4  ;;  %vm147_vm12 = vcmp.eq.s32.totalorder %v979_v46, %v63_v5 }
  0x97   :  { %v637_v6 = vsel %vm163_vm11, 1.0, %v840_v49  ;;  %v621_v7 = vsel %vm147_vm12, 1.0, %v840_v49 }
  0x98   :  { %743 = vmatmul.mubr.msk.f32.gmra.mrb[4].mxu0 %vm246_vm0, %v621_v7  ;;  %767 = vmatmul.mubr.msk.f32.gmra.mrb[4].mxu1 %vm246_vm0, %v637_v6 }
  0x99   :  { %v114_v8 = vpop.permute.xlu1 %113  ;;  %v66_v9 = vpop.permute.xlu0 %65 }
  0x9a   :  { %vm164_vm13 = vcmp.eq.s32.totalorder %v979_v46, %v114_v8  ;;  %vm148_vm14 = vcmp.eq.s32.totalorder %v979_v46, %v66_v9 }
  0x9b   :  { %v638_v10 = vsel %vm164_vm13, 1.0, %v840_v49  ;;  %v622_v11 = vsel %vm148_vm14, 1.0, %v840_v49 }
  0x9c   :  { %745 = vmatprep.mubr.msk.f32.mxu0 %vm246_vm0, %v622_v11  ;;  %769 = vmatprep.mubr.msk.f32.mxu1 %vm246_vm0, %v638_v10 }
  0x9d   :  { %v117_v12 = vpop.permute.xlu1 %116  ;;  %v69_v13 = vpop.permute.xlu0 %68 }
  0x9e   :  { %vm165_vm15 = vcmp.eq.s32.totalorder %v979_v46, %v117_v12  ;;  %vm149_vm1 = vcmp.eq.s32.totalorder %v979_v46, %v69_v13 }
  0x9f   :  { %v639_v14 = vsel %vm165_vm15, 1.0, %v840_v49  ;;  %v623_v15 = vsel %vm149_vm1, 1.0, %v840_v49 }
  0xa0   :  { %746 = vmatmul.mubr.msk.f32.gmra.mrb[6].mxu0 %vm246_vm0, %v623_v15  ;;  %770 = vmatmul.mubr.msk.f32.gmra.mrb[6].mxu1 %vm246_vm0, %v639_v14 }
  0xa1   :  { %v120_v16 = vpop.permute.xlu1 %119  ;;  %v72_v17 = vpop.permute.xlu0 %71 }
  0xa2   :  { %vm166_vm2 = vcmp.eq.s32.totalorder %v979_v46, %v120_v16  ;;  %vm150_vm3 = vcmp.eq.s32.totalorder %v979_v46, %v72_v17 }
  0xa3   :  { %v640_v18 = vsel %vm166_vm2, 1.0, %v840_v49  ;;  %v624_v19 = vsel %vm150_vm3, 1.0, %v840_v49 }
  0xa4   :  { %748 = vmatprep.mubr.msk.f32.mxu0 %vm246_vm0, %v624_v19  ;;  %772 = vmatprep.mubr.msk.f32.mxu1 %vm246_vm0, %v640_v18 }
  0xa5   :  { %v123_v20 = vpop.permute.xlu1 %122  ;;  %v75_v21 = vpop.permute.xlu0 %74 }
  0xa6   :  { %vm167_vm4 = vcmp.eq.s32.totalorder %v979_v46, %v123_v20  ;;  %vm151_vm5 = vcmp.eq.s32.totalorder %v979_v46, %v75_v21 }
  0xa7   :  { %v641_v22 = vsel %vm167_vm4, 1.0, %v840_v49  ;;  %v625_v23 = vsel %vm151_vm5, 1.0, %v840_v49 }
  0xa8   :  { %749 = vmatmul.mubr.msk.f32.gmra.mrb[8].mxu0 %vm246_vm0, %v625_v23  ;;  %773 = vmatmul.mubr.msk.f32.gmra.mrb[8].mxu1 %vm246_vm0, %v641_v22 }
  0xa9   :  { %v126_v24 = vpop.permute.xlu1 %125  ;;  %v78_v25 = vpop.permute.xlu0 %77 }
  0xaa   :  { %vm168_vm6 = vcmp.eq.s32.totalorder %v979_v46, %v126_v24  ;;  %vm152_vm7 = vcmp.eq.s32.totalorder %v979_v46, %v78_v25 }
  0xab   :  { %v642_v26 = vsel %vm168_vm6, 1.0, %v840_v49  ;;  %v626_v27 = vsel %vm152_vm7, 1.0, %v840_v49 }
  0xac   :  { %751 = vmatprep.mubr.msk.f32.mxu0 %vm246_vm0, %v626_v27  ;;  %775 = vmatprep.mubr.msk.f32.mxu1 %vm246_vm0, %v642_v26 }
  0xad   :  { %v129_v28 = vpop.permute.xlu1 %128  ;;  %v81_v29 = vpop.permute.xlu0 %80 }
  0xae   :  { %vm169_vm8 = vcmp.eq.s32.totalorder %v979_v46, %v129_v28  ;;  %vm153_vm9 = vcmp.eq.s32.totalorder %v979_v46, %v81_v29 }
  0xaf   :  { %v643_v30 = vsel %vm169_vm8, 1.0, %v840_v49  ;;  %v627_v31 = vsel %vm153_vm9, 1.0, %v840_v49 }
  0xb0   :  { %752 = vmatmul.mubr.msk.f32.gmra.mrb[10].mxu0 %vm246_vm0, %v627_v31  ;;  %776 = vmatmul.mubr.msk.f32.gmra.mrb[10].mxu1 %vm246_vm0, %v643_v30 }
  0xb1   :  { %v132_v32 = vpop.permute.xlu1 %131  ;;  %v84_v33 = vpop.permute.xlu0 %83 }
  0xb2   :  { %vm170_vm10 = vcmp.eq.s32.totalorder %v979_v46, %v132_v32  ;;  %vm154_vm11 = vcmp.eq.s32.totalorder %v979_v46, %v84_v33 }
  0xb3   :  { %v644_v34 = vsel %vm170_vm10, 1.0, %v840_v49  ;;  %v628_v35 = vsel %vm154_vm11, 1.0, %v840_v49 }
  0xb4   :  { %754 = vmatprep.mubr.msk.f32.mxu0 %vm246_vm0, %v628_v35  ;;  %778 = vmatprep.mubr.msk.f32.mxu1 %vm246_vm0, %v644_v34 }
  0xb5   :  { %v135_v36 = vpop.permute.xlu1 %134  ;;  %v87_v37 = vpop.permute.xlu0 %86 }
  0xb6   :  { %vm171_vm12 = vcmp.eq.s32.totalorder %v979_v46, %v135_v36  ;;  %vm155_vm13 = vcmp.eq.s32.totalorder %v979_v46, %v87_v37 }
  0xb7   :  { %v645_v38 = vsel %vm171_vm12, 1.0, %v840_v49  ;;  %v629_v39 = vsel %vm155_vm13, 1.0, %v840_v49 }
  0xb8   :  { %755 = vmatmul.mubr.msk.f32.gmra.mrb[12].mxu0 %vm246_vm0, %v629_v39  ;;  %779 = vmatmul.mubr.msk.f32.gmra.mrb[12].mxu1 %vm246_vm0, %v645_v38 }
  0xb9   :  { %v138_v40 = vpop.permute.xlu1 %137  ;;  %v90_v41 = vpop.permute.xlu0 %89 }
  0xba   :  { %vm172_vm14 = vcmp.eq.s32.totalorder %v979_v46, %v138_v40  ;;  %vm156_vm15 = vcmp.eq.s32.totalorder %v979_v46, %v90_v41 }
  0xbb   :  { %v646_v42 = vsel %vm172_vm14, 1.0, %v840_v49  ;;  %v630_v43 = vsel %vm156_vm15, 1.0, %v840_v49 }
  0xbc   :  { %757 = vmatprep.mubr.msk.f32.mxu0 %vm246_vm0, %v630_v43  ;;  %781 = vmatprep.mubr.msk.f32.mxu1 %vm246_vm0, %v646_v42 }
  0xbd   :  { %v141_v44 = vpop.permute.xlu1 %140  ;;  %v93_v45 = vpop.permute.xlu0 %92 }
  0xbe   :  { %vm173_vm1 = vcmp.eq.s32.totalorder %v979_v46, %v141_v44  ;;  %vm157_vm2 = vcmp.eq.s32.totalorder %v979_v46, %v93_v45 }
  0xbf   :  { %v647_v47 = vsel %vm173_vm1, 1.0, %v840_v49  ;;  %v631_v48 = vsel %vm157_vm2, 1.0, %v840_v49 }
  0xc0   :  { %758 = vmatmul.mubr.msk.f32.gmra.mrb[14].mxu0 %vm246_vm0, %v631_v48  ;;  %782 = vmatmul.mubr.msk.f32.gmra.mrb[14].mxu1 %vm246_vm0, %v647_v47 }
 0x158   :  { %v738_v50 = vpop.f32.mrb[0].mxu0 }
 0x159   :  { %569 = vst [vmem:[#allocation2 + $0x8] sm:$0xff] %v738_v50  ;;  %v409_v51 = vpop.f32.mrb[1].mxu0 }
 0x15a   :  { %568 = vst [vmem:[#allocation2] sm:$0xff] %v409_v51 }
 0x15c   :  { %v762_v52 = vpop.f32.mrb[0].mxu1 }
 0x15d   :  { %585 = vst [vmem:[#allocation2 + $0x88] sm:$0xff] %v762_v52  ;;  %v489_v53 = vpop.f32.mrb[1].mxu1 }
 0x15e   :  { %584 = vst [vmem:[#allocation2 + $0x80] sm:$0xff] %v489_v53 }
 0x163   :  { %v741_v54 = vpop.f32.mrb[2].mxu0  ;;  %v765_v55 = vpop.f32.mrb[2].mxu1 }
 0x164   :  { %571 = vst [vmem:[#allocation2 + $0x18] sm:$0xff] %v741_v54  ;;  %587 = vst [vmem:[#allocation2 + $0x98] sm:$0xff] %v765_v55  ;;  %v419_v46 = vpop.f32.mrb[3].mxu0  ;;  %v499_v56 = vpop.f32.mrb[3].mxu1 }
 0x165   :  { %570 = vst [vmem:[#allocation2 + $0x10] sm:$0xff] %v419_v46  ;;  %586 = vst [vmem:[#allocation2 + $0x90] sm:$0xff] %v499_v56 }
 0x16b   :  { %v744_v49 = vpop.f32.mrb[4].mxu0  ;;  %v768_v57 = vpop.f32.mrb[4].mxu1 }
 0x16c   :  { %573 = vst [vmem:[#allocation2 + $0x28] sm:$0xff] %v744_v49  ;;  %589 = vst [vmem:[#allocation2 + $0xa8] sm:$0xff] %v768_v57  ;;  %v429_v58 = vpop.f32.mrb[5].mxu0  ;;  %v509_v59 = vpop.f32.mrb[5].mxu1 }
 0x16d   :  { %572 = vst [vmem:[#allocation2 + $0x20] sm:$0xff] %v429_v58  ;;  %588 = vst [vmem:[#allocation2 + $0xa0] sm:$0xff] %v509_v59 }
 0x173   :  { %v747_v60 = vpop.f32.mrb[6].mxu0  ;;  %v771_v61 = vpop.f32.mrb[6].mxu1 }
 0x174   :  { %575 = vst [vmem:[#allocation2 + $0x38] sm:$0xff] %v747_v60  ;;  %591 = vst [vmem:[#allocation2 + $0xb8] sm:$0xff] %v771_v61  ;;  %v439_v62 = vpop.f32.mrb[7].mxu0  ;;  %v519_v63 = vpop.f32.mrb[7].mxu1 }
 0x175   :  { %574 = vst [vmem:[#allocation2 + $0x30] sm:$0xff] %v439_v62  ;;  %590 = vst [vmem:[#allocation2 + $0xb0] sm:$0xff] %v519_v63 }
 0x17b   :  { %v750_v0 = vpop.f32.mrb[8].mxu0  ;;  %v774_v1 = vpop.f32.mrb[8].mxu1 }
 0x17c   :  { %577 = vst [vmem:[#allocation2 + $0x48] sm:$0xff] %v750_v0  ;;  %593 = vst [vmem:[#allocation2 + $0xc8] sm:$0xff] %v774_v1  ;;  %v449_v2 = vpop.f32.mrb[9].mxu0  ;;  %v529_v3 = vpop.f32.mrb[9].mxu1 }
 0x17d   :  { %576 = vst [vmem:[#allocation2 + $0x40] sm:$0xff] %v449_v2  ;;  %592 = vst [vmem:[#allocation2 + $0xc0] sm:$0xff] %v529_v3 }
 0x183   :  { %v753_v4 = vpop.f32.mrb[10].mxu0  ;;  %v777_v5 = vpop.f32.mrb[10].mxu1 }
 0x184   :  { %579 = vst [vmem:[#allocation2 + $0x58] sm:$0xff] %v753_v4  ;;  %595 = vst [vmem:[#allocation2 + $0xd8] sm:$0xff] %v777_v5  ;;  %v459_v6 = vpop.f32.mrb[11].mxu0  ;;  %v539_v7 = vpop.f32.mrb[11].mxu1 }
 0x185   :  { %578 = vst [vmem:[#allocation2 + $0x50] sm:$0xff] %v459_v6  ;;  %594 = vst [vmem:[#allocation2 + $0xd0] sm:$0xff] %v539_v7 }
 0x18b   :  { %v756_v8 = vpop.f32.mrb[12].mxu0  ;;  %v780_v9 = vpop.f32.mrb[12].mxu1 }
 0x18c   :  { %581 = vst [vmem:[#allocation2 + $0x68] sm:$0xff] %v756_v8  ;;  %597 = vst [vmem:[#allocation2 + $0xe8] sm:$0xff] %v780_v9  ;;  %v469_v10 = vpop.f32.mrb[13].mxu0  ;;  %v549_v11 = vpop.f32.mrb[13].mxu1 }
 0x18d   :  { %580 = vst [vmem:[#allocation2 + $0x60] sm:$0xff] %v469_v10  ;;  %596 = vst [vmem:[#allocation2 + $0xe0] sm:$0xff] %v549_v11 }
 0x193   :  { %v759_v12 = vpop.f32.mrb[14].mxu0  ;;  %v783_v13 = vpop.f32.mrb[14].mxu1 }
 0x194   :  { %583 = vst [vmem:[#allocation2 + $0x78] sm:$0xff] %v759_v12  ;;  %599 = vst [vmem:[#allocation2 + $0xf8] sm:$0xff] %v783_v13  ;;  %v479_v14 = vpop.f32.mrb[15].mxu0  ;;  %v559_v15 = vpop.f32.mrb[15].mxu1 }
 0x195   :  { %582 = vst [vmem:[#allocation2 + $0x70] sm:$0xff] %v479_v14  ;;  %598 = vst [vmem:[#allocation2 + $0xf0] sm:$0xff] %v559_v15 }
 0x196   :  { %826 = shalt.err (!%p823_p4)
}
 0x197   :  { %s827_s7 = scalar_lea.hbm %s1091_s2, 4096 }
 0x198   :  { %p828_p5 = scmp.ne.s32.totalorder %s1091_s2, %s827_s7  ;;  %p831_p6 = scmp.lt.u32.totalorder %s827_s7, %s1091_s2 }
 0x19a   :  { %p833_p7 = pnand %p831_p6, %p828_p5 }
 0x19c   :  { %836 = shalt.err (!%p833_p7)
}
 0x19d   :  { %s842_s12 = smov 128   ;;  %s843_s13 = smov 8  }
 0x19e   :  { %611 = dma.vmem_to_hbm [thread:$0]  %s606_s3, 4096, %s1091_s2, [#allocation3], %s842_s12, %s842_s12, %s843_s13  }
 0x19f   :  { %837 = dma.done.wait [#allocation3], 4096  }
 0x1a0   :  { %838 = vsyncadd [#allocation3], 4294963200 }
 0x1a1   :  { %615 = vsyncpa [#allocation3], 1 }

</bundles_post_ra>
